<compile_context>
chip_gen: v7x
topology: tpu7x:2x2x1
jax: 0.10.0
libtpu: 0.0.40
codegen_flags: <defaults>
</compile_context>

<pallas_src>
import math

import jax
import jax.numpy as jnp
from jax.experimental import pallas as pl
from jax.experimental.pallas import tpu as pltpu


def _sn_linear_kernel(inv_sigma_ref, x_ref, w_ref, b_ref, o_ref, acc_ref):
    """acc += x_tile @ w_tile^T (contraction on last axes); finalize: *inv_sigma + b."""
    k = pl.program_id(2)

    @pl.when(k == 0)
    def _():
        acc_ref[...] = jnp.zeros_like(acc_ref)

    # Contract x's last dim with W's last dim -> (tm, tn); W stays in its native
    # (out, in) layout, so no XLU transpose and the K axis is lane-contiguous.
    acc_ref[...] += jax.lax.dot_general(
        x_ref[...], w_ref[...],
        dimension_numbers=(((1,), (1,)), ((), ())),
        preferred_element_type=jnp.float32)

    @pl.when(k == pl.num_programs(2) - 1)
    def _():
        inv_sigma = inv_sigma_ref[0]  # scalar read from SMEM, finalize only
        o_ref[...] = (acc_ref[...] * inv_sigma
                      + b_ref[...].astype(jnp.float32)).astype(o_ref.dtype)


def _round_up(a, b):
    return (a + b - 1) // b * b


def _pick_tile(dim, align, target):
    """Largest tile <= target that is a multiple of `align`; prefers a tile that
    divides `dim` exactly (avoids wrapper-side pad / slice HBM copies)."""
    if dim % align == 0:
        cap = min(target, dim)
        cap -= cap % align
        for cand in range(cap, align - 1, -align):
            if dim % cand == 0:
                return cand
        return align
    # Ragged dim: pad the whole dim up to `align`, capped at target.
    return min(target, _round_up(dim, align))


def _maybe_split_for_two_cores(dim, tile, align):
    """If this axis currently has a single block, halve the tile (aligned) so the
    parallel grid gets >= 2 blocks (keeps both v7x TensorCores busy)."""
    if tile >= dim and dim > align:
        half = _round_up((dim + 1) // 2, align)
        return min(tile, half)
    return tile


def _pad2d(a, rows, cols):
    pr, pc = rows - a.shape[0], cols - a.shape[1]
    if pr or pc:
        a = jnp.pad(a, ((0, pr), (0, pc)))
    return a


def spectral_normalized_linear(x, weight, bias, u, *, n_power_iterations=1, eps=1e-12):
    """Matches PyTorch nn.utils.spectral_norm(nn.Linear(...)) forward (training mode).

    x: [..., in_features]; weight: (out_features, in_features); bias: (out_features,);
    u: (out_features,) power-iteration vector.
    """
    if n_power_iterations < 1:
        raise ValueError("n_power_iterations must be >= 1")

    out_features, in_features = weight.shape
    wd = weight.dtype

    # ---- power iteration (tiny matvecs) on the native-dtype weight, f32 accum ----
    def _normalize(v):
        return v / jnp.maximum(jnp.linalg.norm(v), eps)

    u32 = u.astype(jnp.float32)
    wv = None
    for _ in range(n_power_iterations):
        # v = normalize(W^T u): contract weight dim 0 (out) with u.
        wtu = jax.lax.dot_general(
            weight, u32.astype(wd),
            dimension_numbers=(((0,), (0,)), ((), ())),
            preferred_element_type=jnp.float32)
        v32 = _normalize(wtu)
        # wv = W v: contract weight dim 1 (in) with v.
        wv = jax.lax.dot_general(
            weight, v32.astype(wd),
            dimension_numbers=(((1,), (0,)), ((), ())),
            preferred_element_type=jnp.float32)
        u32 = _normalize(wv)
    # sigma = u . (W v); reuse the last W@v instead of a third full pass over W.
    sigma = jnp.dot(u32, wv)
    inv_sigma = (1.0 / sigma).reshape(1).astype(jnp.float32)

    # ---- tiled Pallas matmul: y = (x @ W^T) * inv_sigma + b ----------------------
    orig_shape = x.shape
    x2d = x.reshape(-1, in_features)
    M = x2d.shape[0]
    N, K = out_features, in_features

    # dtype-aware sublane alignment for the M (sublane) axis of x / output.
    m_align = {4: 8, 2: 16, 1: 32}.get(jnp.dtype(x.dtype).itemsize, 8)

    # Large, VMEM-budgeted tile targets (maximize x / W reuse, amortize the f32
    # accumulator round-trip and per-grid-step overhead).
    tm = _pick_tile(M, m_align, 1024)
    tn = _pick_tile(N, 128, 512)
    tk = _pick_tile(K, 128, 2048)

    # Keep >= 2 (i, j) blocks so both v7x TensorCores get work (cheap elsewhere).
    if _round_up(M, tm) // tm == 1 and _round_up(N, tn) // tn == 1:
        tm = _maybe_split_for_two_cores(M, tm, m_align)
        if _round_up(M, tm) // tm == 1:
            tn = _maybe_split_for_two_cores(N, tn, 128)

    Mp, Np, Kp = _round_up(M, tm), _round_up(N, tn), _round_up(K, tk)

    x_p = _pad2d(x2d, Mp, Kp)                 # storage dtype straight into the MXU
    w_p = _pad2d(weight, Np, Kp)              # storage dtype straight into the MXU
    b_p = _pad2d(bias.reshape(1, N), 1, Np)

    grid = (Mp // tm, Np // tn, Kp // tk)

    # VMEM budget: double-buffered x/W/out tiles + f32 accumulator + bias strip,
    # with 25% headroom, capped at 48 MiB so it is safe on v7x (64 MiB physical)
    # and comfortably below v5e/v6e's 128 MiB.
    tile_bytes = (2 * tm * tk * x_p.dtype.itemsize
                  + 2 * tn * tk * w_p.dtype.itemsize
                  + 2 * tm * tn * x.dtype.itemsize
                  + tm * tn * 4
                  + 2 * tn * b_p.dtype.itemsize)
    vmem_limit = int(min(48 * 1024 * 1024,
                         max(32 * 1024 * 1024, tile_bytes * 5 // 4)))

    cost = pl.CostEstimate(
        flops=2 * M * N * K,
        transcendentals=0,
        bytes_accessed=(x2d.size * x2d.dtype.itemsize
                        + weight.size * weight.dtype.itemsize
                        + bias.size * bias.dtype.itemsize
                        + M * N * x.dtype.itemsize),
    )

    out2d = pl.pallas_call(
        _sn_linear_kernel,
        out_shape=jax.ShapeDtypeStruct((Mp, Np), x.dtype),
        grid_spec=pltpu.PrefetchScalarGridSpec(
            num_scalar_prefetch=0,
            grid=grid,
            in_specs=[
                # inv_sigma scalar lives in SMEM, untiled.
                pl.BlockSpec(memory_space=pltpu.MemorySpace.SMEM),
                # x tile: rows follow i, K-strip follows k.
                pl.BlockSpec((tm, tk), lambda i, j, k: (i, k)),
                # W tile in native (out, in) layout: rows follow j, K-strip follows k.
                pl.BlockSpec((tn, tk), lambda i, j, k: (j, k)),
                # bias strip follows j only.
                pl.BlockSpec((1, tn), lambda i, j, k: (0, j)),
            ],
            out_specs=pl.BlockSpec((tm, tn), lambda i, j, k: (i, j)),
            scratch_shapes=[pltpu.VMEM((tm, tn), jnp.float32)],
        ),
        compiler_params=pltpu.CompilerParams(
            dimension_semantics=("parallel", "parallel", "arbitrary"),
            vmem_limit_bytes=vmem_limit,
        ),
        cost_estimate=cost,
    )(inv_sigma, x_p, w_p, b_p)

    if Mp != M or Np != N:
        out2d = out2d[:M, :N]
    return out2d.reshape(*orig_shape[:-1], out_features)


def init_params(key, in_features, out_features):
    """Deterministic init mirroring nn.Linear + spectral_norm's u vector."""
    kw, kb, ku = jax.random.split(key, 3)
    bound = 1.0 / math.sqrt(in_features)
    weight = jax.random.uniform(kw, (out_features, in_features), jnp.float32, -bound, bound)
    bias = jax.random.uniform(kb, (out_features,), jnp.float32, -bound, bound)
    u = jax.random.normal(ku, (out_features,), jnp.float32)
    u = u / jnp.maximum(jnp.linalg.norm(u), 1e-12)
    return weight, bias, u


if __name__ == "__main__":
    in_features, out_features = 32, 64
    batch, seq = 2, 8

    key = jax.random.PRNGKey(0)
    kx, kp = jax.random.split(key)
    x = jax.random.normal(kx, (batch, seq, in_features), jnp.float32)
    weight, bias, u = init_params(kp, in_features, out_features)

    y = spectral_normalized_linear(x, weight, bias, u)
    y = jax.block_until_ready(y)

    # Reference check (pure JAX) with the same power-iteration semantics.
    def _norm(v):
        return v / jnp.maximum(jnp.linalg.norm(v), 1e-12)

    v_ref = _norm(weight.T @ u)
    u_ref = _norm(weight @ v_ref)
    sigma_ref = jnp.dot(u_ref, weight @ v_ref)
    y_ref = x @ (weight / sigma_ref).T + bias

    assert y.shape == (batch, seq, out_features)
    assert jnp.allclose(y, y_ref, atol=1e-4, rtol=1e-4)

    print("KERNEL_OK")
</pallas_src>

<mosaic_0001>
module attributes {stable_mosaic.version = 11 : i64} {
  func.func @_sn_linear_kernel(%arg0: i32, %arg1: i32, %arg2: i32, %arg3: memref<1xf32, #tpu.memory_space<smem>>, %arg4: memref<8x128xf32, #tpu.memory_space<vmem>>, %arg5: memref<128x128xf32, #tpu.memory_space<vmem>>, %arg6: memref<1x128xf32, #tpu.memory_space<vmem>>, %arg7: memref<8x128xf32, #tpu.memory_space<vmem>>, %arg8: memref<8x128xf32, #tpu.memory_space<vmem>>) attributes {dimension_semantics = [#tpu.dimension_semantics<parallel>, #tpu.dimension_semantics<parallel>, #tpu.dimension_semantics<arbitrary>], iteration_bounds = array<i64: 2, 1, 1>, scalar_prefetch = 0 : i64, scratch_operands = 1 : i64, tpu.core_type = #tpu.core_type<tc>, window_params = [{transform_indices = @transform_0, window_bounds = array<i64: 1>}, {transform_indices = @transform_1, window_bounds = array<i64: 8, 128>}, {transform_indices = @transform_2, window_bounds = array<i64: 128, 128>}, {transform_indices = @transform_3, window_bounds = array<i64: 1, 128>}, {transform_indices = @transform_4, window_bounds = array<i64: 8, 128>}]} {
    %c0_i32 = arith.constant 0 : i32
    %0 = arith.cmpi eq, %arg2, %c0_i32 : i32
    %1 = arith.extui %0 : i1 to i32
    %c0_i32_0 = arith.constant 0 : i32
    %2 = arith.cmpi ne, %1, %c0_i32_0 : i32
    scf.if %2 {
      %cst_10 = arith.constant 0.000000e+00 : f32
      %12 = vector.broadcast %cst_10 : f32 to vector<8x128xf32>
      %c0_11 = arith.constant 0 : index
      %c0_12 = arith.constant 0 : index
      %13 = vector.load %arg8[%c0_11, %c0_12] : memref<8x128xf32, #tpu.memory_space<vmem>>, vector<8x128xf32>
      tpu.vector_store %arg8[%c0_11, %c0_12], %12 {strides = array<i32>} : memref<8x128xf32, #tpu.memory_space<vmem>>, vector<8x128xf32>,
    } else {
    }
    %c0 = arith.constant 0 : index
    %c0_1 = arith.constant 0 : index
    %3 = vector.load %arg8[%c0, %c0_1] : memref<8x128xf32, #tpu.memory_space<vmem>>, vector<8x128xf32>
    %c0_2 = arith.constant 0 : index
    %c0_3 = arith.constant 0 : index
    %4 = vector.load %arg4[%c0_2, %c0_3] : memref<8x128xf32, #tpu.memory_space<vmem>>, vector<8x128xf32>
    %c0_4 = arith.constant 0 : index
    %c0_5 = arith.constant 0 : index
    %5 = vector.load %arg5[%c0_4, %c0_5] : memref<128x128xf32, #tpu.memory_space<vmem>>, vector<128x128xf32>
    %cst = arith.constant dense<0.000000e+00> : vector<8x128xf32>
    %6 = tpu.matmul %4, %5, %cst {dimension_numbers = #tpu.dot_dimension_numbers<[1], [1], [0], [0], [0, 0, 1, 0], [], []>} : vector<8x128xf32>, vector<128x128xf32>, vector<8x128xf32> -> vector<8x128xf32>
    %7 = arith.addf %3, %6 : vector<8x128xf32>
    %c0_6 = arith.constant 0 : index
    %c0_7 = arith.constant 0 : index
    %8 = vector.load %arg8[%c0_6, %c0_7] : memref<8x128xf32, #tpu.memory_space<vmem>>, vector<8x128xf32>
    tpu.vector_store %arg8[%c0_6, %c0_7], %7 {strides = array<i32>} : memref<8x128xf32, #tpu.memory_space<vmem>>, vector<8x128xf32>,
    %c0_i32_8 = arith.constant 0 : i32
    %9 = arith.cmpi eq, %arg2, %c0_i32_8 : i32
    %10 = arith.extui %9 : i1 to i32
    %c0_i32_9 = arith.constant 0 : i32
    %11 = arith.cmpi ne, %10, %c0_i32_9 : i32
    scf.if %11 {
      %c0_10 = arith.constant 0 : index
      %12 = memref.load %arg3[%c0_10] : memref<1xf32, #tpu.memory_space<smem>>
      %c0_11 = arith.constant 0 : index
      %c0_12 = arith.constant 0 : index
      %13 = vector.load %arg8[%c0_11, %c0_12] : memref<8x128xf32, #tpu.memory_space<vmem>>, vector<8x128xf32>
      %14 = vector.broadcast %12 : f32 to vector<8x128xf32>
      %15 = arith.mulf %13, %14 : vector<8x128xf32>
      %c0_13 = arith.constant 0 : index
      %c0_14 = arith.constant 0 : index
      %16 = vector.load %arg6[%c0_13, %c0_14] : memref<1x128xf32, #tpu.memory_space<vmem>>, vector<1x128xf32>
      %17 = vector.broadcast %16 : vector<1x128xf32> to vector<8x128xf32>
      %18 = arith.addf %15, %17 : vector<8x128xf32>
      %c0_15 = arith.constant 0 : index
      %c0_16 = arith.constant 0 : index
      %19 = vector.load %arg7[%c0_15, %c0_16] : memref<8x128xf32, #tpu.memory_space<vmem>>, vector<8x128xf32>
      tpu.vector_store %arg7[%c0_15, %c0_16], %18 {strides = array<i32>} : memref<8x128xf32, #tpu.memory_space<vmem>>, vector<8x128xf32>,
    } else {
    }
    return
  }
  func.func @transform_0(%arg0: i32, %arg1: i32, %arg2: i32) -> i32 {
    %c0_i32 = arith.constant 0 : i32
    %c0_i32_0 = arith.constant 0 : i32
    return %c0_i32 : i32
  }
  func.func @transform_1(%arg0: i32, %arg1: i32, %arg2: i32) -> (i32, i32) {
    %c0_i32 = arith.constant 0 : i32
    return %arg0, %arg2 : i32, i32
  }
  func.func @transform_2(%arg0: i32, %arg1: i32, %arg2: i32) -> (i32, i32) {
    %c0_i32 = arith.constant 0 : i32
    return %arg1, %arg2 : i32, i32
  }
  func.func @transform_3(%arg0: i32, %arg1: i32, %arg2: i32) -> (i32, i32) {
    %c0_i32 = arith.constant 0 : i32
    %c0_i32_0 = arith.constant 0 : i32
    return %c0_i32, %arg1 : i32, i32
  }
  func.func @transform_4(%arg0: i32, %arg1: i32, %arg2: i32) -> (i32, i32) {
    %c0_i32 = arith.constant 0 : i32
    return %arg0, %arg1 : i32, i32
  }
}

</mosaic_0001>

<bundles_post_ra>
// kernel: tpu_custom_call.1
= control target key start
LH: loop header
LB: loop body
LE: loop exit
PB: predicated region body
PF: predicated region fallthrough
CT: control target
= control target key end

     0   :  { %s1091_s0 = inlined_call_operand.<no memory space> [shape: f32[1], index: 0, kind: input, shape index: {}]   ;;  %s1092_s1 = inlined_call_operand.hbm [shape: f32[16,128], index: 1, kind: input, shape index: {}]   ;;  %s1093_s2 = inlined_call_operand.hbm [shape: f32[128,128], index: 2, kind: input, shape index: {}]   ;;  %s1094_s3 = inlined_call_operand.vmem [shape: f32[1,128], index: 3, kind: input, shape index: {}]   ;;  %s1095_s4 = inlined_call_operand.hbm [shape: f32[16,128], index: 4, kind: output, shape index: {}]  }
   0x1   :  { %9 = sst [smem:[#allocation3]] %s1091_s0 }
   0x2   :  { %10 = vsyncpa [#allocation5], 0 }
   0x3   :  { %12 = vsyncpa [#allocation5 + $0x1], 0 }
   0x4   :  { %13 = vsyncpa [#allocation8], 0 }
   0x5   :  { %14 = vsyncpa [#allocation6], 0 }
   0x6   :  { %16 = vsyncpa [#allocation6 + $0x1], 0  ;;  %s867_s17 = smov 0   ;;  %s869_s18 = smov 0  }
   0x7   :  { %s871_s19 = smov 0   ;;  %s873_s20 = smov 0  }
   0x8   :  { %s875_s21 = smov 0   ;;  %s877_s22 = smov 0  }
   0x9 LB: > { %s514_s0 = sadd.s32 4294967295, %s829_s22   ;;  %s515_s23 = sadd.s32 4294967294, %s829_s22   ;;  %s829_s22 = sphi %s877_s22, %s22_s22   ;;  %s825_s21 = sphi %s875_s21, %s1119_s21   ;;  %s821_s20 = sphi %s873_s20, %s1118_s20   ;;  %s817_s19 = sphi %s871_s19, %s1117_s19   ;;  %s813_s18 = sphi %s869_s18, %s1116_s18   ;;  %s809_s17 = sphi %s867_s17, %s1115_s17  }
   0xa   : > { %p84_p0 = scmp.ne.s32.totalorder %s813_s18, %s809_s17  ;;  %p901_p1 = scmp.eq.s32.totalorder %s514_s0, 0 }
   0xb   : > { %p905_p2 = scmp.eq.s32.totalorder %s514_s0, 1  ;;  %p170_p3 = scmp.eq.s32.totalorder %s515_s23, 1 }
   0xc   : > { %s1100_s24 = scalar_select %p901_p1, 1, 0 }
   0xd   : > { %s1101_s25 = scalar_select %p905_p2, 1, 0 }
   0xe   : > { %p911_p4 = por %p901_p1, %p84_p0  ;;  %p516_p5 = scmp.ge.s32.totalorder %s829_s22, 1 }
   0xf   : > { %p916_p6 = por %p170_p3, %p84_p0  ;;  %p177_p7 = scmp.lt.s32.totalorder %s829_s22, 3 }
  0x10   : > { %s1102_s26 = scalar_select %p911_p4, 1, 0 }
  0x11   : > { %s1103_s27 = scalar_select %p916_p6, 1, 0 }
  0x12   : > { %p921_p8 = pnand %p516_p5, %p177_p7  ;;  %s831_s29 = smov [#allocation7]  }
  0x13   : > { %s196_s30 = sshll.u32 %s831_s29, 4  ;;  %s41_s6 = sadd.s32 1, %s825_s21  ;;  %s197_s30 = int_to_ptr.vmem [resolvable:$true] %s196_s30 }
  0x14   : > { %s1104_s28 = scalar_select %p921_p8, 1, 0 }
  0x15   : > { %p615_p9 = pneg %p921_p8  ;;  %s685_s9 = scalar_lea.hbm %s1093_s2, 2048 }
  0x16   : > { %p686_p12 = scmp.ne.s32.totalorder %s1093_s2, %s685_s9  ;;  %p692_p5 = scmp.lt.u32.totalorder %s685_s9, %s1093_s2 }
  0x17   : > { %p930_p11 = pnand %p615_p9, %p901_p1 }
  0x19   : > { %p687_p13 = pneg %p930_p11 }
  0x1b   : > { %p688_p0 = pnand %p687_p13, %p686_p12 }
  0x1d   : > { %p689_p3 = pneg %p688_p0 }
  0x1f   : > { %p694_p7 = pnand %p692_p5, %p689_p3 }
  0x21   : > { %697 = shalt.err (!%p694_p7)
}
  0x22   : > { %s698_s14 = scalar_lea.vmem %s197_s30, 2048  ;;  %p706_p1 = scmp.lt.s32.totalorder %s197_s30, %s197_s30 }
  0x23   : > { %p699_p9 = scmp.ne.s32.totalorder %s197_s30, %s698_s14  ;;  %p707_p4 = scmp.lt.s32.totalorder %s698_s14, %s698_s14 }
  0x25   : > { %p701_p10 = pnand %p699_p9, %p687_p13  ;;  %p708_p8 = por %p707_p4, %p706_p1 }
  0x27   : > { %p702_p6 = pneg %p701_p10 }
  0x29   : > { %p709_p2 = pnand %p708_p8, %p702_p6 }
  0x2b   : > { %712 = shalt.err (!%p709_p2)
}
  0x2c   : > { %s832_s15 = smov 128   ;;  %s833_s16 = smov 8  }
  0x2d   : > { %618 = dma.hbm_to_vmem [thread:$0]  (!%p930_p11), %s1093_s2, 2048, %s197_s30, [#allocation8], %s832_s15, %s832_s15, %s833_s16  }
  0x2e   : > { %p43_p1 = scmp.ge.s32.totalorder %s41_s6, 2  ;;  %s71_s29 = sadd.s32 1, %s817_s19 }
  0x2f   : > { %p78_p2 = scmp.ne.s32.totalorder %s817_s19, %s813_s18  ;;  %p79_p4 = scmp.eq.s32.totalorder %s829_s22, 0 }
  0x30   : > { %s1121_s6 = smov (%p43_p1, %s41_s6), 0  ;;  %p1107_p8 = scmp.ne.s32.totalorder %s1101_s25, 0 }
  0x31   : > { %p957_p6 = por %p79_p4, %p78_p2  ;;  %s66_s5 = ssub.s32 %s825_s21, %s1121_s6 }
  0x32   : > { %p963_p10 = por %p1107_p8, %p78_p2  ;;  %p628_p12 = scmp.lt.s32.totalorder %s829_s22, 2 }
  0x33   : > { %p69_p11 = scmp.eq.s32.totalorder %s66_s5, 0  ;;  %s216_s30 = sand.u32 1, %s817_s19  }
  0x34   : > { %s520_s9 = sshll.u32 %s216_s30, 3  ;;  %s521_s11 = sshll.u32 %s825_s21, 7 }
  0x35   : > { %s972_s10 = scalar_select %p69_p11, %s817_s19, %s71_s29  }
  0x36   : > { %s978_s14 = scalar_lea.hbm %s1092_s1, %s521_s11  ;;  %s220_s25 = scalar_lea.vmem [#allocation4], %s520_s9 }
  0x37   : > { %s228_s15 = sshll.u32 %s220_s25, 4  ;;  %p984_p13 = pnand %p628_p12, %p957_p6  ;;  %s980_s15 = int_to_ptr.vmem [resolvable:$true] %s228_s15 }
  0x38   : > { %s217_s0 = scalar_lea.sflag [#allocation5], %s216_s30  ;;  %s713_s23 = scalar_lea.hbm %s978_s14, 128 }
  0x39   : > { %p714_p0 = scmp.ne.s32.totalorder %s978_s14, %s713_s23  ;;  %p715_p3 = pneg %p984_p13 }
  0x3a   : > { %s718_s9 = scalar_lea.hbm %s1092_s1, 256  ;;  %p719_p9 = scmp.lt.u32.totalorder %s978_s14, %s1092_s1 }
  0x3b   : > { %p716_p5 = pnand %p715_p3, %p714_p0  ;;  %p720_p1 = scmp.lt.u32.totalorder %s718_s9, %s713_s23 }
  0x3c   : > { %p722_p4 = scmp.lt.u32.totalorder %s713_s23, %s978_s14 }
  0x3d   : > { %p717_p7 = pneg %p716_p5  ;;  %p721_p2 = por %p720_p1, %p719_p9 }
  0x3f   : > { %p723_p6 = por %p722_p4, %p721_p2 }
  0x41   : > { %p724_p8 = pnand %p723_p6, %p717_p7 }
  0x43   : > { %727 = shalt.err (!%p724_p8)
}
  0x44   : > { %s728_s30 = scalar_lea.vmem %s980_s15, 128  ;;  %s834_s12 = smov [#allocation4]  }
  0x45   : > { %p729_p12 = scmp.ne.s32.totalorder %s980_s15, %s728_s30  ;;  %s733_s13 = sshll.u32 %s834_s12, 4  ;;  %s734_s13 = int_to_ptr.vmem [resolvable:$false] %s733_s13 }
  0x46   : > { %s735_s25 = scalar_lea.vmem %s734_s13, 256  ;;  %p736_p5 = scmp.lt.s32.totalorder %s980_s15, %s734_s13 }
  0x47   : > { %p731_p11 = pnand %p729_p12, %p715_p3  ;;  %p737_p9 = scmp.lt.s32.totalorder %s735_s25, %s728_s30 }
  0x49   : > { %p732_p0 = pneg %p731_p11  ;;  %p738_p1 = por %p737_p9, %p736_p5 }
  0x4b   : > { %p739_p2 = pnand %p738_p1, %p732_p0 }
  0x4d   : > { %742 = shalt.err (!%p739_p2)
}
  0x4e   : > { %622 = dma.hbm_to_vmem [thread:$0]  (!%p984_p13), %s978_s14, 128, %s980_s15, %s217_s0  }
  0x4f   : > { %p1110_p7 = scmp.ne.s32.totalorder %s1104_s28, 0 }
  0x50   : > { %s1016_s23 = sand.u32 (!%p1110_p7), 1, %s813_s18   ;;  %p1111_p3 = scmp.ne.s32.totalorder (!%p1110_p7), %s1102_s26, 0 }
  0x51   : > { %237 = sbr.rel (%p1110_p7) target bundleno = 389 (0x185), region = 36  ;;  %s523_s29 = sshll.u32 (!%p1110_p7), %s1016_s23, 3 }
  0x52   : > { %s240_s5 = scalar_lea.sflag (!%p1110_p7), [#allocation5], %s1016_s23  ;;  %s1022_s9 = scalar_lea.vmem (!%p1110_p7), [#allocation4], %s523_s29 }
  0x58   : > { %796 = dma.done.wait (%p1111_p3), %s240_s5, 128  }
  0x59   : > { %798 = vsyncadd (%p1111_p3), %s240_s5, 4294967168  ;;  %p1112_p13 = scmp.ne.s32.totalorder %s1100_s24, 0 }
  0x5b   : > { %800 = dma.done.wait (%p1112_p13), [#allocation8], 2048  }
  0x5c   : > { %802 = vsyncadd (%p1112_p13), [#allocation8], 4294965248  ;;  %v835_v0 = vmov 0.0|0.0   ;;  %vm836_vm0 = vmmov 0   ;;  %v837_v1 = vmov 0.0   ;;  %v286_v2 = vld [vmem:[#allocation7] sm:$0xff] }
  0x5d   : > { %583 = vmatprep.subr.bf16.mxu0 %v835_v0  ;;  %580 = vmatprep.mubr.msk.f32.mxu0 %vm836_vm0, %v837_v1  ;;  %v287_v3 = vld [vmem:[#allocation7 + $0x8] sm:$0xff]  ;;  %v288_v5 = vld [vmem:[#allocation7 + $0x10] sm:$0xff]  ;;  %v289_v6 = vld [vmem:[#allocation7 + $0x18] sm:$0xff]  ;;  %s377_s24 = sld [smem:[#allocation3]]  ;;  %s528_s14 = sshll.u32 %s821_s20, 7 }
  0x5e   : > { %v584_v4 = vpack.c.bf16 %v287_v3, %v286_v2  ;;  %v587_v7 = vpack.c.bf16 %v289_v6, %v288_v5  ;;  %v290_v8 = vld [vmem:[#allocation7 + $0x20] sm:$0xff]  ;;  %v291_v9 = vld [vmem:[#allocation7 + $0x28] sm:$0xff]  ;;  %v292_v11 = vld [vmem:[#allocation7 + $0x30] sm:$0xff]  ;;  %s274_s15 = scalar_lea.vmem [#allocation9], %s523_s29  ;;  %s1042_s11 = scalar_lea.hbm %s1095_s4, %s528_s14 }
  0x5f   : > { %v590_v10 = vpack.c.bf16 %v291_v9, %v290_v8  ;;  %v293_v12 = vld [vmem:[#allocation7 + $0x38] sm:$0xff]  ;;  %v294_v14 = vld [vmem:[#allocation7 + $0x40] sm:$0xff]  ;;  %v295_v15 = vld [vmem:[#allocation7 + $0x48] sm:$0xff]  ;;  %s405_s16 = sshll.u32 %s274_s15, 4  ;;  %s391_s30 = scalar_lea.sflag [#allocation6], %s1016_s23  ;;  %s1044_s16 = int_to_ptr.vmem [resolvable:$true] %s405_s16 }
  0x60   : > { %585 = vmatpush3.bf16.xpose.msra.mxu0 %v584_v4  ;;  %v593_v13 = vpack.c.bf16 %v293_v12, %v292_v11  ;;  %v596_v16 = vpack.c.bf16 %v295_v15, %v294_v14  ;;  %v296_v17 = vld [vmem:[#allocation7 + $0x50] sm:$0xff]  ;;  %v297_v18 = vld [vmem:[#allocation7 + $0x58] sm:$0xff]  ;;  %v298_v20 = vld [vmem:[#allocation7 + $0x60] sm:$0xff]  ;;  %s743_s12 = scalar_lea.vmem %s1044_s16, 128  ;;  %s838_s20 = smov [#allocation9]  }
  0x61   : > { %586 = vmatprep.subr.bf16.mxu0 %v835_v0  ;;  %v599_v19 = vpack.c.bf16 %v297_v18, %v296_v17  ;;  %v299_v21 = vld [vmem:[#allocation7 + $0x68] sm:$0xff]  ;;  %v300_v23 = vld [vmem:[#allocation7 + $0x70] sm:$0xff]  ;;  %v301_v24 = vld [vmem:[#allocation7 + $0x78] sm:$0xff]  ;;  %p744_p4 = scmp.ne.s32.totalorder %s1044_s16, %s743_s12  ;;  %s747_s13 = sshll.u32 %s838_s20, 4  ;;  %s748_s13 = int_to_ptr.vmem [resolvable:$false] %s747_s13 }
  0x62   : > { %v602_v22 = vpack.c.bf16 %v299_v21, %v298_v20  ;;  %v605_v25 = vpack.c.bf16 %v301_v24, %v300_v23  ;;  %v285_v26 = vld [vmem:[%s1022_s9] sm:$0xff]  ;;  %s749_s25 = scalar_lea.vmem %s748_s13, 256  ;;  %p750_p12 = scmp.lt.s32.totalorder %s1044_s16, %s748_s13 }
  0x63   : > { %v379_v27 = vstv %s377_s24  ;;  %v526_v29 = vld [vmem:[%s1094_s3] ss:$0 sm:$0xff]  ;;  %p745_p6 = pnand %p744_p4, %p963_p10  ;;  %p751_p11 = scmp.lt.s32.totalorder %s749_s25, %s743_s12 }
  0x65   : > { %p746_p8 = pneg %p745_p6  ;;  %p752_p0 = por %p751_p11, %p750_p12 }
  0x67   : > { %p753_p5 = pnand %p752_p0, %p746_p8 }
  0x68   : > { %588 = vmatpush3.bf16.xpose.msra.mxu0 %v587_v7 }
  0x69   : > { %589 = vmatprep.subr.bf16.mxu0 %v835_v0 }
  0x70   : > { %591 = vmatpush3.bf16.xpose.msra.mxu0 %v590_v10 }
  0x71   : > { %592 = vmatprep.subr.bf16.mxu0 %v835_v0 }
  0x78   : > { %594 = vmatpush3.bf16.xpose.msra.mxu0 %v593_v13 }
  0x79   : > { %595 = vmatprep.subr.bf16.mxu0 %v835_v0 }
  0x80   : > { %597 = vmatpush3.bf16.xpose.msra.mxu0 %v596_v16 }
  0x81   : > { %598 = vmatprep.subr.bf16.mxu0 %v835_v0 }
  0x88   : > { %600 = vmatpush3.bf16.xpose.msra.mxu0 %v599_v19 }
  0x89   : > { %601 = vmatprep.subr.bf16.mxu0 %v835_v0 }
  0x90   : > { %603 = vmatpush3.bf16.xpose.msra.mxu0 %v602_v22 }
  0x91   : > { %604 = vmatprep.subr.bf16.mxu0 %v835_v0 }
  0x98   : > { %606 = vmatpush3.bf16.xpose.msra.mxu0 %v605_v25 }
  0x9f   : > { %581 = vmatmul.mubr.f32.vlgmr.msra.gmra.mrb[0].mxu0 %v285_v26 }
 0x172   : > { %v368_v28 = vpop.f32.mrb[0].mxu0 }
 0x173   : > { %v380_v30 = vmul.f32 %v379_v27, %v368_v28  ;;  %v582_v31 = vpop.f32.mrb[1].mxu0 }
 0x175   : > { %v388_v32 = vadd.f32 %v526_v29, %v380_v30 }
 0x177   : > { %389 = vst [vmem:[%s274_s15] sm:$0xff] %v388_v32 }
 0x178   : > { %756 = shalt.err (!%p753_p5)
}
 0x179   : > { %s757_s23 = scalar_lea.hbm %s1042_s11, 128  ;;  %s761_s9 = scalar_lea.hbm %s1095_s4, 256 }
 0x17a   : > { %p758_p9 = scmp.ne.s32.totalorder %s1042_s11, %s757_s23  ;;  %p762_p7 = scmp.lt.u32.totalorder %s1042_s11, %s1095_s4 }
 0x17b   : > { %p763_p3 = scmp.lt.u32.totalorder %s761_s9, %s757_s23  ;;  %p765_p4 = scmp.lt.u32.totalorder %s757_s23, %s1042_s11 }
 0x17c   : > { %p759_p1 = pnand %p758_p9, %p963_p10 }
 0x17d   : > { %p764_p13 = por %p763_p3, %p762_p7 }
 0x17e   : > { %p760_p2 = pneg %p759_p1 }
 0x17f   : > { %p766_p6 = por %p765_p4, %p764_p13 }
 0x181   : > { %p767_p8 = pnand %p766_p6, %p760_p2 }
 0x183   : > { %770 = shalt.err (!%p767_p8)
}
 0x184   : > { %613 = dma.vmem_to_hbm [thread:$0]  (%p963_p10), %s1044_s16, 128, %s1042_s11, %s391_s30  }
 0x185 PF: > { %s417_s28 = sand.u32 1, %s809_s17   ;;  %p1113_p12 = scmp.ne.s32.totalorder %s1103_s27, 0 }
 0x186   : > { %p1114_p11 = scmp.ge.s32.totalorder %s829_s22, 2  ;;  %s418_s14 = scalar_lea.sflag [#allocation6], %s417_s28 }
 0x188   : > { %p624_p0 = pnand %p1114_p11, %p1113_p12 }
 0x18a   : > { %804 = dma.done.wait (!%p624_p0), %s418_s14, 128  }
 0x18b   : > { %806 = vsyncadd (!%p624_p0), %s418_s14, 4294967168  ;;  %s22_s22 = sadd.s32 1, %s829_s22   ;;  %s1115_s17 = smov %s813_s18 }
 0x18c   : > { %p19_p5 = scmp.ge.s32.totalorder %s22_s22, 4   ;;  %s1116_s18 = smov %s817_s19 }
 0x18d   : > { %s1117_s19 = smov %s972_s10  ;;  %s1118_s20 = smov %s825_s21 }
 0x18e   : > { %s1119_s21 = smov %s1121_s6  ;;  %21 = sbr.rel (!%p19_p5) target bundleno = 9 (0x9), region = 97 }
 0x195   :  { %423 = vsyncpa [#allocation5], 1 }
 0x196   :  { %425 = vsyncpa [#allocation5 + $0x1], 1 }
 0x197   :  { %426 = vsyncpa [#allocation8], 1 }
 0x198   :  { %427 = vsyncpa [#allocation6], 1 }
 0x199   :  { %429 = vsyncpa [#allocation6 + $0x1], 1 }

</bundles_post_ra>
